<compile_context>
chip_gen: v7x
topology: tpu7x:2x2x1
jax: 0.10.0
libtpu: 0.0.40
codegen_flags: <defaults>
</compile_context>

<pallas_src>
import jax
import jax.numpy as jnp
from jax import lax
from jax.experimental import pallas as pl
from jax.experimental.pallas import tpu as pltpu


# ------------------------------------------------------------------ kernel

_NT = (((1,), (1,)), ((), ()))   # contract last dims of both operands: a @ b.T, no transpose op


def _semantic_match_kernel(p_ref, q_ref, p_add_ref, q_add_ref,
                           wp_ref, bp_ref, wq_ref, bq_ref, wh_ref, bh_ref,
                           head_ref, pw_ref, qw_ref,
                           p_sc, q_sc):
    f32 = jnp.float32
    bf16 = jnp.bfloat16
    layer = pl.program_id(1)
    n_layers = pl.num_programs(1)
    D = p_sc.shape[1]

    def mx(a, b):                       # bf16 MXU feed, f32 accumulation
        return jnp.dot(a.astype(bf16), b.astype(bf16), preferred_element_type=f32)

    def mx_nt(a, b):                    # a @ b.T via dot_general (no explicit transpose)
        return lax.dot_general(a.astype(bf16), b.astype(bf16), _NT,
                               preferred_element_type=f32)

    # Load activations into VMEM scratch once per batch element; they stay resident across
    # the sequential layer axis.
    @pl.when(layer == 0)
    def _():
        p_sc[...] = p_ref[0].astype(f32)
        q_sc[...] = q_ref[0].astype(f32)

    P = p_sc[...]                       # (Lp, D) f32
    Q = q_sc[...]                       # (Lq, D) f32

    # Affinity + additive masks (masks pre-converted to (1 - m) * -1e4 in the wrapper).
    A = mx_nt(P, Q) + p_add_ref[0] + q_add_ref[0]           # (Lp, Lq)

    row_max = jnp.max(A, axis=1, keepdims=True)             # (Lp, 1) -> torch p_weight
    col_max = jnp.max(A, axis=0, keepdims=True)             # (1, Lq) -> torch q_weight

    # Row softmax (over Lq) and column softmax (over Lp), both built from un-transposed A;
    # only the small normalized matrix is transposed (once).
    e_row = jnp.exp(A - row_max)
    e_col = jnp.exp(A - col_max)
    a_q = e_row * (1.0 / jnp.sum(e_row, axis=1, keepdims=True))      # (Lp, Lq)
    a_p_cols = e_col * (1.0 / jnp.sum(e_col, axis=0, keepdims=True))
    a_p = a_p_cols.T                                                 # (Lq, Lp)

    P_q = mx(a_q, Q)                    # (Lp, D)
    Q_p = mx(a_p, P)                    # (Lq, D)
    AqQp = mx(a_q, Q_p)                 # (Lp, D) = left half of A_q @ [Q_p | Q]
    ApPq = mx(a_p, P_q)                 # (Lq, D) = left half of A_p @ [P_q | P]

    # Concat-free Linear: cat([X, Y], -1) @ W == X @ W[:D] + Y @ W[D:]  (static ref slices).
    P_lin = mx(AqQp, wp_ref[0, :D, :]) + mx(P_q, wp_ref[0, D:, :]) + bp_ref[0]
    Q_lin = mx(ApPq, wq_ref[0, :D, :]) + mx(Q_p, wq_ref[0, D:, :]) + bq_ref[0]

    def _ln2d(x):                       # LayerNorm over (seq, dim), no affine, eps=1e-5
        n = x.shape[0] * x.shape[1]
        mu = jnp.sum(x, keepdims=True) * (1.0 / n)
        xc = x - mu
        var = jnp.sum(xc * xc, keepdims=True) * (1.0 / n)
        return xc * lax.rsqrt(var + 1e-5)

    P_new = _ln2d(P + P_lin)
    Q_new = _ln2d(Q + Q_lin)
    p_sc[...] = P_new
    q_sc[...] = Q_new

    # Final layer: emit last-layer attention maxima + the fused pooled head.
    # (These outputs are tiny and written once per batch element, so the store cost is
    #  negligible; p_weight is kept (Lp, 1)-shaped to avoid an in-kernel vector transpose.)
    @pl.when(layer == n_layers - 1)
    def _():
        pw_ref[0] = row_max.astype(pw_ref.dtype)            # (Lp, 1)
        qw_ref[0] = col_max.astype(qw_ref.dtype)            # (1, Lq)
        p_max = jnp.max(P_new, axis=0, keepdims=True)       # (1, D)
        q_max = jnp.max(Q_new, axis=0, keepdims=True)       # (1, D)
        y = mx(p_max, wh_ref[:D, :]) + mx(q_max, wh_ref[D:, :]) + bh_ref[...]
        head_ref[0] = jnp.maximum(y, 0.0).astype(head_ref.dtype)


# ------------------------------------------------------------------ wrapper


def _round_up(v, m):
    return ((v + m - 1) // m) * m


def _vmem_limit_bytes(LQ, LO, D):
    """Rough per-grid-step VMEM estimate ((8,128)-padded f32) with generous headroom."""
    f = 4
    slab = (_round_up(LQ, 8) + _round_up(LO, 8)) * _round_up(D, 128) * f
    aff = _round_up(LQ, 8) * _round_up(LO, 128) * f
    wts = 2 * (_round_up(2 * D, 8) * _round_up(D, 128) + 8 * _round_up(D, 128)) * f
    small = (_round_up(LQ, 8) * 128 + 8 * _round_up(LO, 128) + 2 * 8 * _round_up(D, 128)) * f
    est = 2 * (slab + wts + small) + slab + 8 * aff + 8 * slab   # dbl-buffered IO + temporaries
    est = int(est * 1.5) + (4 << 20)
    return max(16 << 20, min(est, 64 << 20))


def semantic_match_forward(q, o, mask_q, mask_o, layer_params, w_head_t, b_head):
    """SemanticMatch.forward as one fused Pallas kernel.

    q: (B, LQ, D), o: (B, LO, D); masks: (B, L) with 1 = valid.
    layer_params: list of (W_p.T, b_p, W_q.T, b_q) per DPDA layer (torch weights transposed).
    Returns (q_o, q_weight, o_weight) exactly like the torch module.
    """
    B, LQ, D = q.shape
    LO = o.shape[1]
    n_layers = len(layer_params)

    wp_all = jnp.stack([wp for (wp, _, _, _) in layer_params])               # (L, 2D, D)
    bp_all = jnp.stack([bp.reshape(1, D) for (_, bp, _, _) in layer_params]) # (L, 1, D)
    wq_all = jnp.stack([wq for (_, _, wq, _) in layer_params])
    bq_all = jnp.stack([bq.reshape(1, D) for (_, _, _, bq) in layer_params])
    bh = b_head.reshape(1, D)

    p_add = ((1.0 - mask_q.astype(jnp.float32)) * -10000.0).reshape(B, LQ, 1)
    q_add = ((1.0 - mask_o.astype(jnp.float32)) * -10000.0).reshape(B, 1, LO)

    out_shape = (
        jax.ShapeDtypeStruct((B, 1, D), q.dtype),       # pooled head (q_o)
        jax.ShapeDtypeStruct((B, LQ, 1), jnp.float32),  # q_weight (last layer)
        jax.ShapeDtypeStruct((B, 1, LO), jnp.float32),  # o_weight (last layer)
    )
    grid_spec = pltpu.PrefetchScalarGridSpec(
        num_scalar_prefetch=0,
        grid=(B, n_layers),
        in_specs=[
            pl.BlockSpec((1, LQ, D), lambda b, l: (b, 0, 0)),       # q stream (P)
            pl.BlockSpec((1, LO, D), lambda b, l: (b, 0, 0)),       # o stream (Q)
            pl.BlockSpec((1, LQ, 1), lambda b, l: (b, 0, 0)),       # additive mask (q side)
            pl.BlockSpec((1, 1, LO), lambda b, l: (b, 0, 0)),       # additive mask (o side)
            pl.BlockSpec((1, 2 * D, D), lambda b, l: (l, 0, 0)),    # W_p.T for layer l
            pl.BlockSpec((1, 1, D), lambda b, l: (l, 0, 0)),        # b_p for layer l
            pl.BlockSpec((1, 2 * D, D), lambda b, l: (l, 0, 0)),    # W_q.T for layer l
            pl.BlockSpec((1, 1, D), lambda b, l: (l, 0, 0)),        # b_q for layer l
            pl.BlockSpec((2 * D, D), lambda b, l: (0, 0)),          # head W.T (resident)
            pl.BlockSpec((1, D), lambda b, l: (0, 0)),              # head bias (resident)
        ],
        out_specs=[
            pl.BlockSpec((1, 1, D), lambda b, l: (b, 0, 0)),
            pl.BlockSpec((1, LQ, 1), lambda b, l: (b, 0, 0)),
            pl.BlockSpec((1, 1, LO), lambda b, l: (b, 0, 0)),
        ],
        scratch_shapes=[
            pltpu.VMEM((LQ, D), jnp.float32),    # P carried across layers
            pltpu.VMEM((LO, D), jnp.float32),    # Q carried across layers
        ],
    )
    head, q_w, o_w = pl.pallas_call(
        _semantic_match_kernel,
        out_shape=out_shape,
        grid_spec=grid_spec,
        compiler_params=pltpu.CompilerParams(
            dimension_semantics=("parallel", "arbitrary"),
            vmem_limit_bytes=_vmem_limit_bytes(LQ, LO, D),
        ),
    )(q, o, p_add, q_add, wp_all, bp_all, wq_all, bq_all, w_head_t, bh)

    return head.reshape(B, D), q_w.reshape(B, LQ), o_w.reshape(B, LO)


# ------------------------------------------------------------------ reference (plain JAX)


def _ref_semantic_match(q, o, mask_q, mask_o, layer_params, w_head_t, b_head):
    """Plain-JAX reference with the same math as the torch module.  Matmul operands are
    rounded to bf16 (with f32 accumulation) to mirror the kernel's MXU feed precision."""
    bf16, f32 = jnp.bfloat16, jnp.float32
    p_add = ((1.0 - mask_q.astype(f32)) * -10000.0)[:, :, None]
    q_add = ((1.0 - mask_o.astype(f32)) * -10000.0)[:, None, :]

    def mm(a, b):
        return jnp.einsum("blm,bmd->bld", a.astype(bf16), b.astype(bf16),
                          preferred_element_type=f32)

    def lin(x, w, b):
        return jnp.einsum("blk,kd->bld", x.astype(bf16), w.astype(bf16),
                          preferred_element_type=f32) + b

    def ln(x):
        mu = jnp.mean(x, axis=(1, 2), keepdims=True)
        var = jnp.mean((x - mu) ** 2, axis=(1, 2), keepdims=True)
        return (x - mu) * lax.rsqrt(var + 1e-5)

    P, Q = q, o
    q_w = o_w = None
    for (wp_t, bp, wq_t, bq) in layer_params:
        A = jnp.einsum("bld,bmd->blm", P.astype(bf16), Q.astype(bf16),
                       preferred_element_type=f32)
        A = A + p_add + q_add
        q_w = jnp.max(A, axis=2)
        o_w = jnp.max(A, axis=1)
        A_q = jax.nn.softmax(A, axis=2)
        A_p = jax.nn.softmax(jnp.swapaxes(A, 1, 2), axis=2)
        P_q = mm(A_q, Q)
        Q_p = mm(A_p, P)
        P_t = jnp.concatenate([P_q, P], axis=2)
        Q_t = jnp.concatenate([Q_p, Q], axis=2)
        Pn = mm(A_q, Q_t)
        Qn = mm(A_p, P_t)
        P = ln(P + lin(Pn, wp_t, bp))
        Q = ln(Q + lin(Qn, wq_t, bq))

    p_max = jnp.max(P, axis=1)
    q_max = jnp.max(Q, axis=1)
    cat = jnp.concatenate([p_max, q_max], axis=1)
    y = jnp.einsum("bk,kd->bd", cat.astype(bf16), w_head_t.astype(bf16),
                   preferred_element_type=f32) + b_head
    return jnp.maximum(y, 0.0), q_w, o_w


# ------------------------------------------------------------------ demo / check


if __name__ == "__main__":
    B, LQ, LO, D, LAYERS = 2, 8, 16, 32, 2

    key = jax.random.PRNGKey(0)
    keys = jax.random.split(key, 2 + 4 * LAYERS + 2)

    q = jax.random.normal(keys[0], (B, LQ, D), dtype=jnp.float32)
    o = jax.random.normal(keys[1], (B, LO, D), dtype=jnp.float32)

    # batch 0 fully valid; batch 1 has trailing padding in both streams
    mask_q = (jnp.arange(LQ)[None, :] < jnp.array([LQ, LQ - 2])[:, None]).astype(jnp.float32)
    mask_o = (jnp.arange(LO)[None, :] < jnp.array([LO, LO - 5])[:, None]).astype(jnp.float32)

    layer_params = []
    for layer in range(LAYERS):
        k0, k1, k2, k3 = keys[2 + 4 * layer: 6 + 4 * layer]
        wp_t = jax.random.normal(k0, (2 * D, D), dtype=jnp.float32) * 0.05  # torch W_p.T
        bp = jax.random.normal(k1, (D,), dtype=jnp.float32) * 0.05
        wq_t = jax.random.normal(k2, (2 * D, D), dtype=jnp.float32) * 0.05  # torch W_q.T
        bq = jax.random.normal(k3, (D,), dtype=jnp.float32) * 0.05
        layer_params.append((wp_t, bp, wq_t, bq))

    w_head_t = jax.random.normal(keys[-2], (2 * D, D), dtype=jnp.float32) * 0.05  # linear W.T
    b_head = jax.random.normal(keys[-1], (D,), dtype=jnp.float32) * 0.05

    q_o, q_weight, o_weight = semantic_match_forward(
        q, o, mask_q, mask_o, layer_params, w_head_t, b_head)
    q_o = jax.block_until_ready(q_o)
    q_weight = jax.block_until_ready(q_weight)
    o_weight = jax.block_until_ready(o_weight)

    ref_qo, ref_qw, ref_ow = _ref_semantic_match(
        q, o, mask_q, mask_o, layer_params, w_head_t, b_head)

    assert q_o.shape == (B, D)
    assert q_weight.shape == (B, LQ)
    assert o_weight.shape == (B, LO)
    assert jnp.allclose(q_o, ref_qo, atol=2e-2, rtol=2e-2)
    assert jnp.allclose(q_weight, ref_qw, atol=2e-2, rtol=2e-2)
    assert jnp.allclose(o_weight, ref_ow, atol=2e-2, rtol=2e-2)

    print("KERNEL_OK")
</pallas_src>

<mosaic_0001>
module attributes {stable_mosaic.version = 11 : i64} {
  func.func @_semantic_match_kernel(%arg0: i32, %arg1: i32, %arg2: memref<1x8x32xf32, #tpu.memory_space<vmem>>, %arg3: memref<1x16x32xf32, #tpu.memory_space<vmem>>, %arg4: memref<1x8x1xf32, #tpu.memory_space<vmem>>, %arg5: memref<1x1x16xf32, #tpu.memory_space<vmem>>, %arg6: memref<1x64x32xf32, #tpu.memory_space<vmem>>, %arg7: memref<1x1x32xf32, #tpu.memory_space<vmem>>, %arg8: memref<1x64x32xf32, #tpu.memory_space<vmem>>, %arg9: memref<1x1x32xf32, #tpu.memory_space<vmem>>, %arg10: memref<64x32xf32, #tpu.memory_space<vmem>>, %arg11: memref<1x32xf32, #tpu.memory_space<vmem>>, %arg12: memref<1x1x32xf32, #tpu.memory_space<vmem>>, %arg13: memref<1x8x1xf32, #tpu.memory_space<vmem>>, %arg14: memref<1x1x16xf32, #tpu.memory_space<vmem>>, %arg15: memref<8x32xf32, #tpu.memory_space<vmem>>, %arg16: memref<16x32xf32, #tpu.memory_space<vmem>>) attributes {dimension_semantics = [#tpu.dimension_semantics<parallel>, #tpu.dimension_semantics<arbitrary>], iteration_bounds = array<i64: 2, 2>, scalar_prefetch = 0 : i64, scratch_operands = 2 : i64, tpu.core_type = #tpu.core_type<tc>, window_params = [{transform_indices = @transform_0, window_bounds = array<i64: 1, 8, 32>}, {transform_indices = @transform_1, window_bounds = array<i64: 1, 16, 32>}, {transform_indices = @transform_2, window_bounds = array<i64: 1, 8, 1>}, {transform_indices = @transform_3, window_bounds = array<i64: 1, 1, 16>}, {transform_indices = @transform_4, window_bounds = array<i64: 1, 64, 32>}, {transform_indices = @transform_5, window_bounds = array<i64: 1, 1, 32>}, {transform_indices = @transform_6, window_bounds = array<i64: 1, 64, 32>}, {transform_indices = @transform_7, window_bounds = array<i64: 1, 1, 32>}, {pipeline_mode = #tpu.pipeline_mode<synchronous>, transform_indices = @transform_8, window_bounds = array<i64: 64, 32>}, {pipeline_mode = #tpu.pipeline_mode<synchronous>, transform_indices = @transform_9, window_bounds = array<i64: 1, 32>}, {transform_indices = @transform_10, window_bounds = array<i64: 1, 1, 32>}, {transform_indices = @transform_11, window_bounds = array<i64: 1, 8, 1>}, {transform_indices = @transform_12, window_bounds = array<i64: 1, 1, 16>}]} {
    %c0_i32 = arith.constant 0 : i32
    %0 = arith.cmpi eq, %arg1, %c0_i32 : i32
    %1 = arith.extui %0 : i1 to i32
    %c0_i32_0 = arith.constant 0 : i32
    %2 = arith.cmpi ne, %1, %c0_i32_0 : i32
    scf.if %2 {
      %c0_56 = arith.constant 0 : index
      %c0_57 = arith.constant 0 : index
      %c0_58 = arith.constant 0 : index
      %132 = vector.load %arg2[%c0_56, %c0_57, %c0_58] : memref<1x8x32xf32, #tpu.memory_space<vmem>>, vector<1x8x32xf32>
      %133 = vector.shape_cast %132 : vector<1x8x32xf32> to vector<8x32xf32>
      %c0_59 = arith.constant 0 : index
      %c0_60 = arith.constant 0 : index
      %134 = vector.load %arg15[%c0_59, %c0_60] : memref<8x32xf32, #tpu.memory_space<vmem>>, vector<8x32xf32>
      tpu.vector_store %arg15[%c0_59, %c0_60], %133 {strides = array<i32>} : memref<8x32xf32, #tpu.memory_space<vmem>>, vector<8x32xf32>,
      %c0_61 = arith.constant 0 : index
      %c0_62 = arith.constant 0 : index
      %c0_63 = arith.constant 0 : index
      %135 = vector.load %arg3[%c0_61, %c0_62, %c0_63] : memref<1x16x32xf32, #tpu.memory_space<vmem>>, vector<1x16x32xf32>
      %136 = vector.shape_cast %135 : vector<1x16x32xf32> to vector<16x32xf32>
      %c0_64 = arith.constant 0 : index
      %c0_65 = arith.constant 0 : index
      %137 = vector.load %arg16[%c0_64, %c0_65] : memref<16x32xf32, #tpu.memory_space<vmem>>, vector<16x32xf32>
      tpu.vector_store %arg16[%c0_64, %c0_65], %136 {strides = array<i32>} : memref<16x32xf32, #tpu.memory_space<vmem>>, vector<16x32xf32>,
    } else {
    }
    %c0 = arith.constant 0 : index
    %c0_1 = arith.constant 0 : index
    %3 = vector.load %arg15[%c0, %c0_1] : memref<8x32xf32, #tpu.memory_space<vmem>>, vector<8x32xf32>
    %c0_2 = arith.constant 0 : index
    %c0_3 = arith.constant 0 : index
    %4 = vector.load %arg16[%c0_2, %c0_3] : memref<16x32xf32, #tpu.memory_space<vmem>>, vector<16x32xf32>
    %5 = arith.truncf %3 : vector<8x32xf32> to vector<8x32xbf16>
    %6 = arith.truncf %4 : vector<16x32xf32> to vector<16x32xbf16>
    %cst = arith.constant dense<0.000000e+00> : vector<8x16xf32>
    %7 = tpu.matmul %5, %6, %cst {dimension_numbers = #tpu.dot_dimension_numbers<[1], [1], [0], [0], [0, 0, 1, 0], [], []>} : vector<8x32xbf16>, vector<16x32xbf16>, vector<8x16xf32> -> vector<8x16xf32>
    %c0_4 = arith.constant 0 : index
    %c0_5 = arith.constant 0 : index
    %c0_6 = arith.constant 0 : index
    %8 = vector.load %arg4[%c0_4, %c0_5, %c0_6] : memref<1x8x1xf32, #tpu.memory_space<vmem>>, vector<1x8x1xf32>
    %9 = vector.shape_cast %8 : vector<1x8x1xf32> to vector<8x1xf32>
    %10 = vector.broadcast %9 : vector<8x1xf32> to vector<8x16xf32>
    %11 = arith.addf %7, %10 : vector<8x16xf32>
    %c0_7 = arith.constant 0 : index
    %c0_8 = arith.constant 0 : index
    %c0_9 = arith.constant 0 : index
    %12 = vector.load %arg5[%c0_7, %c0_8, %c0_9] : memref<1x1x16xf32, #tpu.memory_space<vmem>>, vector<1x1x16xf32>
    %13 = vector.shape_cast %12 : vector<1x1x16xf32> to vector<1x16xf32>
    %14 = vector.broadcast %13 : vector<1x16xf32> to vector<8x16xf32>
    %15 = arith.addf %11, %14 : vector<8x16xf32>
    %cst_10 = arith.constant dense<0xFF800000> : vector<8xf32>
    %16 = vector.multi_reduction <maximumf>, %15, %cst_10 [1] : vector<8x16xf32> to vector<8xf32>
    %17 = vector.shape_cast %16 : vector<8xf32> to vector<8x1xf32>
    %cst_11 = arith.constant dense<0xFF800000> : vector<16xf32>
    %18 = vector.multi_reduction <maximumf>, %15, %cst_11 [0] : vector<8x16xf32> to vector<16xf32>
    %19 = vector.shape_cast %18 : vector<16xf32> to vector<1x16xf32>
    %20 = vector.broadcast %17 : vector<8x1xf32> to vector<8x16xf32>
    %21 = arith.subf %15, %20 : vector<8x16xf32>
    %22 = math.exp %21 : vector<8x16xf32>
    %23 = vector.broadcast %19 : vector<1x16xf32> to vector<8x16xf32>
    %24 = arith.subf %15, %23 : vector<8x16xf32>
    %25 = math.exp %24 : vector<8x16xf32>
    %cst_12 = arith.constant dense<0.000000e+00> : vector<8xf32>
    %26 = vector.multi_reduction <add>, %22, %cst_12 [1] : vector<8x16xf32> to vector<8xf32>
    %27 = vector.shape_cast %26 : vector<8xf32> to vector<8x1xf32>
    %cst_13 = arith.constant 1.000000e+00 : f32
    %28 = vector.broadcast %cst_13 : f32 to vector<8x1xf32>
    %29 = arith.divf %28, %27 : vector<8x1xf32>
    %30 = vector.broadcast %29 : vector<8x1xf32> to vector<8x16xf32>
    %31 = arith.mulf %22, %30 : vector<8x16xf32>
    %cst_14 = arith.constant dense<0.000000e+00> : vector<16xf32>
    %32 = vector.multi_reduction <add>, %25, %cst_14 [0] : vector<8x16xf32> to vector<16xf32>
    %33 = vector.shape_cast %32 : vector<16xf32> to vector<1x16xf32>
    %cst_15 = arith.constant 1.000000e+00 : f32
    %34 = vector.broadcast %cst_15 : f32 to vector<1x16xf32>
    %35 = arith.divf %34, %33 : vector<1x16xf32>
    %36 = vector.broadcast %35 : vector<1x16xf32> to vector<8x16xf32>
    %37 = arith.mulf %25, %36 : vector<8x16xf32>
    %38 = tpu.transpose %37, [1, 0] : vector<8x16xf32> -> vector<16x8xf32>
    %39 = arith.truncf %31 : vector<8x16xf32> to vector<8x16xbf16>
    %40 = arith.truncf %4 : vector<16x32xf32> to vector<16x32xbf16>
    %cst_16 = arith.constant dense<0.000000e+00> : vector<8x32xf32>
    %41 = tpu.matmul %39, %40, %cst_16 {dimension_numbers = #tpu.dot_dimension_numbers<[1], [0], [0], [1], [0, 0, 1, 1], [], []>} : vector<8x16xbf16>, vector<16x32xbf16>, vector<8x32xf32> -> vector<8x32xf32>
    %42 = arith.truncf %38 : vector<16x8xf32> to vector<16x8xbf16>
    %43 = arith.truncf %3 : vector<8x32xf32> to vector<8x32xbf16>
    %cst_17 = arith.constant dense<0.000000e+00> : vector<16x32xf32>
    %44 = tpu.matmul %42, %43, %cst_17 {dimension_numbers = #tpu.dot_dimension_numbers<[1], [0], [0], [1], [0, 0, 1, 1], [], []>} : vector<16x8xbf16>, vector<8x32xbf16>, vector<16x32xf32> -> vector<16x32xf32>
    %45 = arith.truncf %31 : vector<8x16xf32> to vector<8x16xbf16>
    %46 = arith.truncf %44 : vector<16x32xf32> to vector<16x32xbf16>
    %cst_18 = arith.constant dense<0.000000e+00> : vector<8x32xf32>
    %47 = tpu.matmul %45, %46, %cst_18 {dimension_numbers = #tpu.dot_dimension_numbers<[1], [0], [0], [1], [0, 0, 1, 1], [], []>} : vector<8x16xbf16>, vector<16x32xbf16>, vector<8x32xf32> -> vector<8x32xf32>
    %48 = arith.truncf %38 : vector<16x8xf32> to vector<16x8xbf16>
    %49 = arith.truncf %41 : vector<8x32xf32> to vector<8x32xbf16>
    %cst_19 = arith.constant dense<0.000000e+00> : vector<16x32xf32>
    %50 = tpu.matmul %48, %49, %cst_19 {dimension_numbers = #tpu.dot_dimension_numbers<[1], [0], [0], [1], [0, 0, 1, 1], [], []>} : vector<16x8xbf16>, vector<8x32xbf16>, vector<16x32xf32> -> vector<16x32xf32>
    %c0_20 = arith.constant 0 : index
    %c0_21 = arith.constant 0 : index
    %c0_22 = arith.constant 0 : index
    %51 = vector.load %arg6[%c0_20, %c0_21, %c0_22] : memref<1x64x32xf32, #tpu.memory_space<vmem>>, vector<1x32x32xf32>
    %52 = vector.shape_cast %51 : vector<1x32x32xf32> to vector<32x32xf32>
    %53 = arith.truncf %47 : vector<8x32xf32> to vector<8x32xbf16>
    %54 = arith.truncf %52 : vector<32x32xf32> to vector<32x32xbf16>
    %cst_23 = arith.constant dense<0.000000e+00> : vector<8x32xf32>
    %55 = tpu.matmul %53, %54, %cst_23 {dimension_numbers = #tpu.dot_dimension_numbers<[1], [0], [0], [1], [0, 0, 1, 1], [], []>} : vector<8x32xbf16>, vector<32x32xbf16>, vector<8x32xf32> -> vector<8x32xf32>
    %c0_24 = arith.constant 0 : index
    %c32 = arith.constant 32 : index
    %c0_25 = arith.constant 0 : index
    %56 = vector.load %arg6[%c0_24, %c32, %c0_25] : memref<1x64x32xf32, #tpu.memory_space<vmem>>, vector<1x32x32xf32>
    %57 = vector.shape_cast %56 : vector<1x32x32xf32> to vector<32x32xf32>
    %58 = arith.truncf %41 : vector<8x32xf32> to vector<8x32xbf16>
    %59 = arith.truncf %57 : vector<32x32xf32> to vector<32x32xbf16>
    %cst_26 = arith.constant dense<0.000000e+00> : vector<8x32xf32>
    %60 = tpu.matmul %58, %59, %cst_26 {dimension_numbers = #tpu.dot_dimension_numbers<[1], [0], [0], [1], [0, 0, 1, 1], [], []>} : vector<8x32xbf16>, vector<32x32xbf16>, vector<8x32xf32> -> vector<8x32xf32>
    %61 = arith.addf %55, %60 : vector<8x32xf32>
    %c0_27 = arith.constant 0 : index
    %c0_28 = arith.constant 0 : index
    %c0_29 = arith.constant 0 : index
    %62 = vector.load %arg7[%c0_27, %c0_28, %c0_29] : memref<1x1x32xf32, #tpu.memory_space<vmem>>, vector<1x1x32xf32>
    %63 = vector.shape_cast %62 : vector<1x1x32xf32> to vector<1x32xf32>
    %64 = vector.broadcast %63 : vector<1x32xf32> to vector<8x32xf32>
    %65 = arith.addf %61, %64 : vector<8x32xf32>
    %c0_30 = arith.constant 0 : index
    %c0_31 = arith.constant 0 : index
    %c0_32 = arith.constant 0 : index
    %66 = vector.load %arg8[%c0_30, %c0_31, %c0_32] : memref<1x64x32xf32, #tpu.memory_space<vmem>>, vector<1x32x32xf32>
    %67 = vector.shape_cast %66 : vector<1x32x32xf32> to vector<32x32xf32>
    %68 = arith.truncf %50 : vector<16x32xf32> to vector<16x32xbf16>
    %69 = arith.truncf %67 : vector<32x32xf32> to vector<32x32xbf16>
    %cst_33 = arith.constant dense<0.000000e+00> : vector<16x32xf32>
    %70 = tpu.matmul %68, %69, %cst_33 {dimension_numbers = #tpu.dot_dimension_numbers<[1], [0], [0], [1], [0, 0, 1, 1], [], []>} : vector<16x32xbf16>, vector<32x32xbf16>, vector<16x32xf32> -> vector<16x32xf32>
    %c0_34 = arith.constant 0 : index
    %c32_35 = arith.constant 32 : index
    %c0_36 = arith.constant 0 : index
    %71 = vector.load %arg8[%c0_34, %c32_35, %c0_36] : memref<1x64x32xf32, #tpu.memory_space<vmem>>, vector<1x32x32xf32>
    %72 = vector.shape_cast %71 : vector<1x32x32xf32> to vector<32x32xf32>
    %73 = arith.truncf %44 : vector<16x32xf32> to vector<16x32xbf16>
    %74 = arith.truncf %72 : vector<32x32xf32> to vector<32x32xbf16>
    %cst_37 = arith.constant dense<0.000000e+00> : vector<16x32xf32>
    %75 = tpu.matmul %73, %74, %cst_37 {dimension_numbers = #tpu.dot_dimension_numbers<[1], [0], [0], [1], [0, 0, 1, 1], [], []>} : vector<16x32xbf16>, vector<32x32xbf16>, vector<16x32xf32> -> vector<16x32xf32>
    %76 = arith.addf %70, %75 : vector<16x32xf32>
    %c0_38 = arith.constant 0 : index
    %c0_39 = arith.constant 0 : index
    %c0_40 = arith.constant 0 : index
    %77 = vector.load %arg9[%c0_38, %c0_39, %c0_40] : memref<1x1x32xf32, #tpu.memory_space<vmem>>, vector<1x1x32xf32>
    %78 = vector.shape_cast %77 : vector<1x1x32xf32> to vector<1x32xf32>
    %79 = vector.broadcast %78 : vector<1x32xf32> to vector<16x32xf32>
    %80 = arith.addf %76, %79 : vector<16x32xf32>
    %81 = arith.addf %3, %65 : vector<8x32xf32>
    %82 = vector.shape_cast %81 : vector<8x32xf32> to vector<1x8x32xf32>
    %cst_41 = arith.constant dense<0.000000e+00> : vector<1xf32>
    %83 = vector.multi_reduction <add>, %82, %cst_41 [1, 2] : vector<1x8x32xf32> to vector<1xf32>
    %84 = vector.shape_cast %83 : vector<1xf32> to vector<1x1x1xf32>
    %85 = vector.extract %84[0, 0, 0] : f32 from vector<1x1x1xf32>
    %86 = vector.broadcast %85 : f32 to vector<1x1xf32>
    %cst_42 = arith.constant 3.906250e-03 : f32
    %87 = vector.broadcast %cst_42 : f32 to vector<1x1xf32>
    %88 = arith.mulf %86, %87 : vector<1x1xf32>
    %89 = vector.broadcast %88 : vector<1x1xf32> to vector<8x32xf32>
    %90 = arith.subf %81, %89 : vector<8x32xf32>
    %91 = arith.mulf %90, %90 : vector<8x32xf32>
    %92 = vector.shape_cast %91 : vector<8x32xf32> to vector<1x8x32xf32>
    %cst_43 = arith.constant dense<0.000000e+00> : vector<1xf32>
    %93 = vector.multi_reduction <add>, %92, %cst_43 [1, 2] : vector<1x8x32xf32> to vector<1xf32>
    %94 = vector.shape_cast %93 : vector<1xf32> to vector<1x1x1xf32>
    %95 = vector.extract %94[0, 0, 0] : f32 from vector<1x1x1xf32>
    %96 = vector.broadcast %95 : f32 to vector<1x1xf32>
    %cst_44 = arith.constant 3.906250e-03 : f32
    %97 = vector.broadcast %cst_44 : f32 to vector<1x1xf32>
    %98 = arith.mulf %96, %97 : vector<1x1xf32>
    %cst_45 = arith.constant 9.99999974E-6 : f32
    %99 = vector.broadcast %cst_45 : f32 to vector<1x1xf32>
    %100 = arith.addf %98, %99 : vector<1x1xf32>
    %101 = math.rsqrt %100 : vector<1x1xf32>
    %102 = vector.broadcast %101 : vector<1x1xf32> to vector<8x32xf32>
    %103 = arith.mulf %90, %102 : vector<8x32xf32>
    %104 = arith.addf %4, %80 : vector<16x32xf32>
    %105 = vector.shape_cast %104 : vector<16x32xf32> to vector<1x16x32xf32>
    %cst_46 = arith.constant dense<0.000000e+00> : vector<1xf32>
    %106 = vector.multi_reduction <add>, %105, %cst_46 [1, 2] : vector<1x16x32xf32> to vector<1xf32>
    %107 = vector.shape_cast %106 : vector<1xf32> to vector<1x1x1xf32>
    %108 = vector.extract %107[0, 0, 0] : f32 from vector<1x1x1xf32>
    %109 = vector.broadcast %108 : f32 to vector<1x1xf32>
    %cst_47 = arith.constant 0.001953125 : f32
    %110 = vector.broadcast %cst_47 : f32 to vector<1x1xf32>
    %111 = arith.mulf %109, %110 : vector<1x1xf32>
    %112 = vector.broadcast %111 : vector<1x1xf32> to vector<16x32xf32>
    %113 = arith.subf %104, %112 : vector<16x32xf32>
    %114 = arith.mulf %113, %113 : vector<16x32xf32>
    %115 = vector.shape_cast %114 : vector<16x32xf32> to vector<1x16x32xf32>
    %cst_48 = arith.constant dense<0.000000e+00> : vector<1xf32>
    %116 = vector.multi_reduction <add>, %115, %cst_48 [1, 2] : vector<1x16x32xf32> to vector<1xf32>
    %117 = vector.shape_cast %116 : vector<1xf32> to vector<1x1x1xf32>
    %118 = vector.extract %117[0, 0, 0] : f32 from vector<1x1x1xf32>
    %119 = vector.broadcast %118 : f32 to vector<1x1xf32>
    %cst_49 = arith.constant 0.001953125 : f32
    %120 = vector.broadcast %cst_49 : f32 to vector<1x1xf32>
    %121 = arith.mulf %119, %120 : vector<1x1xf32>
    %cst_50 = arith.constant 9.99999974E-6 : f32
    %122 = vector.broadcast %cst_50 : f32 to vector<1x1xf32>
    %123 = arith.addf %121, %122 : vector<1x1xf32>
    %124 = math.rsqrt %123 : vector<1x1xf32>
    %125 = vector.broadcast %124 : vector<1x1xf32> to vector<16x32xf32>
    %126 = arith.mulf %113, %125 : vector<16x32xf32>
    %c0_51 = arith.constant 0 : index
    %c0_52 = arith.constant 0 : index
    %127 = vector.load %arg15[%c0_51, %c0_52] : memref<8x32xf32, #tpu.memory_space<vmem>>, vector<8x32xf32>
    tpu.vector_store %arg15[%c0_51, %c0_52], %103 {strides = array<i32>} : memref<8x32xf32, #tpu.memory_space<vmem>>, vector<8x32xf32>,
    %c0_53 = arith.constant 0 : index
    %c0_54 = arith.constant 0 : index
    %128 = vector.load %arg16[%c0_53, %c0_54] : memref<16x32xf32, #tpu.memory_space<vmem>>, vector<16x32xf32>
    tpu.vector_store %arg16[%c0_53, %c0_54], %126 {strides = array<i32>} : memref<16x32xf32, #tpu.memory_space<vmem>>, vector<16x32xf32>,
    %c1_i32 = arith.constant 1 : i32
    %129 = arith.cmpi eq, %arg1, %c1_i32 : i32
    %130 = arith.extui %129 : i1 to i32
    %c0_i32_55 = arith.constant 0 : i32
    %131 = arith.cmpi ne, %130, %c0_i32_55 : i32
    scf.if %131 {
      %c0_56 = arith.constant 0 : index
      %c0_57 = arith.constant 0 : index
      %c0_58 = arith.constant 0 : index
      %132 = vector.load %arg13[%c0_56, %c0_57, %c0_58] : memref<1x8x1xf32, #tpu.memory_space<vmem>>, vector<1x8x1xf32>
      %133 = vector.shape_cast %132 : vector<1x8x1xf32> to vector<8x1xf32>
      %134 = vector.shape_cast %17 : vector<8x1xf32> to vector<1x8x1xf32>
      tpu.vector_store %arg13[%c0_56, %c0_57, %c0_58], %134 {strides = array<i32>} : memref<1x8x1xf32, #tpu.memory_space<vmem>>, vector<1x8x1xf32>,
      %c0_59 = arith.constant 0 : index
      %c0_60 = arith.constant 0 : index
      %c0_61 = arith.constant 0 : index
      %135 = vector.load %arg14[%c0_59, %c0_60, %c0_61] : memref<1x1x16xf32, #tpu.memory_space<vmem>>, vector<1x1x16xf32>
      %136 = vector.shape_cast %135 : vector<1x1x16xf32> to vector<1x16xf32>
      %137 = vector.shape_cast %19 : vector<1x16xf32> to vector<1x1x16xf32>
      tpu.vector_store %arg14[%c0_59, %c0_60, %c0_61], %137 {strides = array<i32>} : memref<1x1x16xf32, #tpu.memory_space<vmem>>, vector<1x1x16xf32>,
      %cst_62 = arith.constant dense<0xFF800000> : vector<32xf32>
      %138 = vector.multi_reduction <maximumf>, %103, %cst_62 [0] : vector<8x32xf32> to vector<32xf32>
      %139 = vector.shape_cast %138 : vector<32xf32> to vector<1x32xf32>
      %cst_63 = arith.constant dense<0xFF800000> : vector<32xf32>
      %140 = vector.multi_reduction <maximumf>, %126, %cst_63 [0] : vector<16x32xf32> to vector<32xf32>
      %141 = vector.shape_cast %140 : vector<32xf32> to vector<1x32xf32>
      %c0_64 = arith.constant 0 : index
      %c0_65 = arith.constant 0 : index
      %142 = vector.load %arg10[%c0_64, %c0_65] : memref<64x32xf32, #tpu.memory_space<vmem>>, vector<32x32xf32>
      %143 = arith.truncf %139 : vector<1x32xf32> to vector<1x32xbf16>
      %144 = arith.truncf %142 : vector<32x32xf32> to vector<32x32xbf16>
      %cst_66 = arith.constant dense<0.000000e+00> : vector<1x32xf32>
      %145 = tpu.matmul %143, %144, %cst_66 {dimension_numbers = #tpu.dot_dimension_numbers<[1], [0], [0], [1], [0, 0, 1, 1], [], []>} : vector<1x32xbf16>, vector<32x32xbf16>, vector<1x32xf32> -> vector<1x32xf32>
      %c32_67 = arith.constant 32 : index
      %c0_68 = arith.constant 0 : index
      %146 = vector.load %arg10[%c32_67, %c0_68] : memref<64x32xf32, #tpu.memory_space<vmem>>, vector<32x32xf32>
      %147 = arith.truncf %141 : vector<1x32xf32> to vector<1x32xbf16>
      %148 = arith.truncf %146 : vector<32x32xf32> to vector<32x32xbf16>
      %cst_69 = arith.constant dense<0.000000e+00> : vector<1x32xf32>
      %149 = tpu.matmul %147, %148, %cst_69 {dimension_numbers = #tpu.dot_dimension_numbers<[1], [0], [0], [1], [0, 0, 1, 1], [], []>} : vector<1x32xbf16>, vector<32x32xbf16>, vector<1x32xf32> -> vector<1x32xf32>
      %150 = arith.addf %145, %149 : vector<1x32xf32>
      %c0_70 = arith.constant 0 : index
      %c0_71 = arith.constant 0 : index
      %151 = vector.load %arg11[%c0_70, %c0_71] : memref<1x32xf32, #tpu.memory_space<vmem>>, vector<1x32xf32>
      %152 = arith.addf %150, %151 : vector<1x32xf32>
      %cst_72 = arith.constant 0.000000e+00 : f32
      %153 = vector.broadcast %cst_72 : f32 to vector<1x32xf32>
      %154 = arith.maximumf %152, %153 : vector<1x32xf32>
      %c0_73 = arith.constant 0 : index
      %c0_74 = arith.constant 0 : index
      %c0_75 = arith.constant 0 : index
      %155 = vector.load %arg12[%c0_73, %c0_74, %c0_75] : memref<1x1x32xf32, #tpu.memory_space<vmem>>, vector<1x1x32xf32>
      %156 = vector.shape_cast %155 : vector<1x1x32xf32> to vector<1x32xf32>
      %157 = vector.shape_cast %154 : vector<1x32xf32> to vector<1x1x32xf32>
      tpu.vector_store %arg12[%c0_73, %c0_74, %c0_75], %157 {strides = array<i32>} : memref<1x1x32xf32, #tpu.memory_space<vmem>>, vector<1x1x32xf32>,
    } else {
    }
    return
  }
  func.func @transform_0(%arg0: i32, %arg1: i32) -> (i32, i32, i32) {
    %c0_i32 = arith.constant 0 : i32
    %c0_i32_0 = arith.constant 0 : i32
    %c0_i32_1 = arith.constant 0 : i32
    return %arg0, %c0_i32, %c0_i32_0 : i32, i32, i32
  }
  func.func @transform_1(%arg0: i32, %arg1: i32) -> (i32, i32, i32) {
    %c0_i32 = arith.constant 0 : i32
    %c0_i32_0 = arith.constant 0 : i32
    %c0_i32_1 = arith.constant 0 : i32
    return %arg0, %c0_i32, %c0_i32_0 : i32, i32, i32
  }
  func.func @transform_2(%arg0: i32, %arg1: i32) -> (i32, i32, i32) {
    %c0_i32 = arith.constant 0 : i32
    %c0_i32_0 = arith.constant 0 : i32
    %c0_i32_1 = arith.constant 0 : i32
    return %arg0, %c0_i32, %c0_i32_0 : i32, i32, i32
  }
  func.func @transform_3(%arg0: i32, %arg1: i32) -> (i32, i32, i32) {
    %c0_i32 = arith.constant 0 : i32
    %c0_i32_0 = arith.constant 0 : i32
    %c0_i32_1 = arith.constant 0 : i32
    return %arg0, %c0_i32, %c0_i32_0 : i32, i32, i32
  }
  func.func @transform_4(%arg0: i32, %arg1: i32) -> (i32, i32, i32) {
    %c0_i32 = arith.constant 0 : i32
    %c0_i32_0 = arith.constant 0 : i32
    %c0_i32_1 = arith.constant 0 : i32
    return %arg1, %c0_i32, %c0_i32_0 : i32, i32, i32
  }
  func.func @transform_5(%arg0: i32, %arg1: i32) -> (i32, i32, i32) {
    %c0_i32 = arith.constant 0 : i32
    %c0_i32_0 = arith.constant 0 : i32
    %c0_i32_1 = arith.constant 0 : i32
    return %arg1, %c0_i32, %c0_i32_0 : i32, i32, i32
  }
  func.func @transform_6(%arg0: i32, %arg1: i32) -> (i32, i32, i32) {
    %c0_i32 = arith.constant 0 : i32
    %c0_i32_0 = arith.constant 0 : i32
    %c0_i32_1 = arith.constant 0 : i32
    return %arg1, %c0_i32, %c0_i32_0 : i32, i32, i32
  }
  func.func @transform_7(%arg0: i32, %arg1: i32) -> (i32, i32, i32) {
    %c0_i32 = arith.constant 0 : i32
    %c0_i32_0 = arith.constant 0 : i32
    %c0_i32_1 = arith.constant 0 : i32
    return %arg1, %c0_i32, %c0_i32_0 : i32, i32, i32
  }
  func.func @transform_8(%arg0: i32, %arg1: i32) -> (i32, i32) {
    %c0_i32 = arith.constant 0 : i32
    %c0_i32_0 = arith.constant 0 : i32
    %c0_i32_1 = arith.constant 0 : i32
    return %c0_i32, %c0_i32_0 : i32, i32
  }
  func.func @transform_9(%arg0: i32, %arg1: i32) -> (i32, i32) {
    %c0_i32 = arith.constant 0 : i32
    %c0_i32_0 = arith.constant 0 : i32
    %c0_i32_1 = arith.constant 0 : i32
    return %c0_i32, %c0_i32_0 : i32, i32
  }
  func.func @transform_10(%arg0: i32, %arg1: i32) -> (i32, i32, i32) {
    %c0_i32 = arith.constant 0 : i32
    %c0_i32_0 = arith.constant 0 : i32
    %c0_i32_1 = arith.constant 0 : i32
    return %arg0, %c0_i32, %c0_i32_0 : i32, i32, i32
  }
  func.func @transform_11(%arg0: i32, %arg1: i32) -> (i32, i32, i32) {
    %c0_i32 = arith.constant 0 : i32
    %c0_i32_0 = arith.constant 0 : i32
    %c0_i32_1 = arith.constant 0 : i32
    return %arg0, %c0_i32, %c0_i32_0 : i32, i32, i32
  }
  func.func @transform_12(%arg0: i32, %arg1: i32) -> (i32, i32, i32) {
    %c0_i32 = arith.constant 0 : i32
    %c0_i32_0 = arith.constant 0 : i32
    %c0_i32_1 = arith.constant 0 : i32
    return %arg0, %c0_i32, %c0_i32_0 : i32, i32, i32
  }
}

</mosaic_0001>

<bundles_post_ra>
// kernel: tpu_custom_call.1
= control target key start
LH: loop header
LB: loop body
LE: loop exit
PB: predicated region body
PF: predicated region fallthrough
CT: control target
= control target key end

     0   :  { %s2326_s0 = inlined_call_operand.vmem [shape: f32[2,8,32], index: 0, kind: input, shape index: {}]   ;;  %s2327_s1 = inlined_call_operand.vmem [shape: f32[2,16,32], index: 1, kind: input, shape index: {}]   ;;  %s2328_s2 = inlined_call_operand.vmem [shape: f32[2,8,1], index: 2, kind: input, shape index: {}]   ;;  %s2329_s3 = inlined_call_operand.vmem [shape: f32[2,1,16], index: 3, kind: input, shape index: {}]   ;;  %s2330_s4 = inlined_call_operand.vmem [shape: f32[2,64,32], index: 4, kind: input, shape index: {}]   ;;  %s2331_s5 = inlined_call_operand.vmem [shape: f32[2,1,32], index: 5, kind: input, shape index: {}]   ;;  %s2332_s6 = inlined_call_operand.vmem [shape: f32[2,64,32], index: 6, kind: input, shape index: {}]   ;;  %s2333_s7 = inlined_call_operand.vmem [shape: f32[2,1,32], index: 7, kind: input, shape index: {}]   ;;  %s2334_s8 = inlined_call_operand.vmem [shape: f32[64,32], index: 8, kind: input, shape index: {}]   ;;  %s2335_s9 = inlined_call_operand.vmem [shape: f32[1,32], index: 9, kind: input, shape index: {}]   ;;  %s2336_s10 = inlined_call_operand.hbm [shape: f32[2,1,32], index: 10, kind: output, shape index: {0}]   ;;  %s2337_s11 = inlined_call_operand.vmem [shape: f32[2,8,1], index: 11, kind: output, shape index: {1}]   ;;  %s2338_s12 = inlined_call_operand.hbm [shape: f32[2,1,16], index: 12, kind: output, shape index: {2}]  }
   0x1   :  { %2354 = sst [smem:[#allocation22_spill]] %s2326_s0 }
   0x2   :  { %2355 = sst [smem:[#allocation23_spill]] %s2327_s1 }
   0x3   :  { %2356 = sst [smem:[#allocation24_spill]] %s2328_s2 }
   0x4   :  { %2357 = sst [smem:[#allocation25_spill]] %s2336_s10 }
   0x5   :  { %2358 = sst [smem:[#allocation26_spill]] %s2338_s12 }
   0x6   :  { %18 = vsyncpa [#allocation5], 0 }
   0x7   :  { %20 = vsyncpa [#allocation5 + $0x1], 0 }
   0x8   :  { %21 = vsyncpa [#allocation7], 0 }
   0x9   :  { %23 = vsyncpa [#allocation7 + $0x1], 0  ;;  %s1971_s21 = smov 0   ;;  %s1973_s22 = smov 0  }
   0xa   :  { %s1975_s23 = smov 0   ;;  %s1977_s24 = smov 0  }
   0xb   :  { %s1979_s25 = smov 0   ;;  %s1981_s26 = smov 0  }
   0xc   :  { %s1983_s27 = smov 0   ;;  %s1985_s28 = smov 0  }
   0xd LB: > { %2359 = sst [smem:[#allocation10_spill]] %s1869_s21  ;;  %s1526_s29 = sadd.s32 4294967295, %s1897_s28   ;;  %s1897_s28 = sphi %s1985_s28, %s29_s28   ;;  %s1893_s27 = sphi %s1983_s27, %s2393_s27   ;;  %s1889_s26 = sphi %s1981_s26, %s2392_s26   ;;  %s1885_s25 = sphi %s1979_s25, %s2391_s25   ;;  %s1881_s24 = sphi %s1977_s24, %s2390_s24   ;;  %s1877_s23 = sphi %s1975_s23, %s2389_s23   ;;  %s1873_s22 = sphi %s1973_s22, %s2388_s22   ;;  %s1869_s21 = sphi %s1971_s21, %s2387_s21  }
   0xe   : > { %2360 = sst [smem:[#allocation11_spill]] %s1873_s22  ;;  %s1527_s30 = sadd.s32 4294967294, %s1897_s28  }
   0xf   : > { %2361 = sst [smem:[#allocation12_spill]] %s1877_s23  ;;  %s38_s13 = sadd.s32 1, %s1889_s26 }
  0x10   : > { %2362 = sst [smem:[#allocation13_spill]] %s1885_s25  ;;  %p39_p0 = scmp.ge.s32.totalorder %s38_s13, 2 }
  0x11   : > { %2363 = sst [smem:[#allocation14_spill]] %s1889_s26  ;;  %s41_s14 = sadd.s32 1, %s1893_s27 }
  0x12   : > { %2364 = sst [smem:[#allocation15_spill]] %s1893_s27  ;;  %p308_p1 = scmp.ne.s32.totalorder %s1877_s23, %s1873_s22 }
  0x13   : > { %2365 = sst [smem:[#allocation16_spill]] %s1897_s28  ;;  %p309_p2 = scmp.eq.s32.totalorder %s1526_s29, 3 }
  0x14   : > { %s2395_s13 = smov (%p39_p0, %s38_s13), 0  ;;  %s2397_s14 = smov (!%p39_p0, %s41_s14), %s1893_s27 }
  0x15   : > { %2366 = sst [smem:[#allocation17_spill]] %s2395_s13  ;;  %p2020_p3 = por %p309_p2, %p308_p1 }
  0x16   : > { %p314_p4 = scmp.ne.s32.totalorder %s1873_s22, %s1869_s21  ;;  %p43_p5 = scmp.ge.s32.totalorder %s2397_s14, 2 }
  0x17   : > { %s2367_s15 = scalar_select %p2020_p3, 1, 0 }
  0x18   : > { %p315_p6 = scmp.eq.s32.totalorder %s1527_s30, 3  ;;  %p1530_p7 = scmp.ge.s32.totalorder %s1897_s28, 1 }
  0x19   : > { %2368 = sst [smem:[#allocation18_spill]] %s2367_s15  ;;  %p447_p8 = scmp.lt.s32.totalorder %s1897_s28, 5 }
  0x1a   : > { %s2399_s14 = smov (%p43_p5, %s2397_s14), 0  ;;  %p2030_p9 = por %p315_p6, %p314_p4 }
  0x1b   : > { %2369 = sst [smem:[#allocation19_spill]] %s2399_s14  ;;  %p448_p10 = pnand %p1530_p7, %p447_p8 }
  0x1c   : > { %s2370_s16 = scalar_select %p2030_p9, 1, 0 }
  0x1d   : > { %s295_s17 = ssub.s32 %s1893_s27, %s2399_s14  ;;  %s298_s18 = sadd.s32 1, %s1877_s23 }
  0x1e   : > { %2371 = sst [smem:[#allocation20_spill]] %s2370_s16  ;;  %p296_p11 = scmp.eq.s32.totalorder %s295_s17, 0 }
  0x1f   : > { %451 = sbr.rel (%p448_p10) target bundleno = 2213 (0x8a5), region = 60  ;;  %s2041_s20 = sand.u32 (!%p448_p10), 1, %s1873_s22  }
  0x20   : > { %s2038_s19 = scalar_select %p296_p11, %s1877_s23, %s298_s18  }
  0x21   : > { %p523_p12 = scmp.lt.s32.totalorder (!%p448_p10), %s1885_s25, 1  ;;  %p539_p13 = scmp.lt.s32.totalorder (!%p448_p10), %s1881_s24, 1 }
  0x22   : > { %2372 = sst [smem:[#allocation21_spill]] %s2038_s19  ;;  %s2373_s0 = sld [smem:[#allocation22_spill]] (!%p448_p10) }
  0x23   : > { %s2374_s1 = sld [smem:[#allocation23_spill]] (!%p448_p10)  ;;  %s2375_s2 = sld [smem:[#allocation24_spill]] (!%p448_p10) }
  0x24   : > { %s510_s14 = scalar_lea.vmem (!%p448_p10), [#allocation4], %s2041_s20  ;;  %p1540_p0 = scmp.ne.s32.totalorder (!%p448_p10), %s1881_s24, 0 }
  0x26   : > { %s2045_s29 = scalar_select %p523_p12, %s1885_s25, 1 }
  0x27   : > { %s2068_s10 = scalar_select %p539_p13, %s1881_s24, 1 }
  0x28   : > { %s2049_s30 = sshll.u32 %s2045_s29, 3  ;;  %s1560_s17 = sshll.u32 %s2045_s29, 4  ;;  %vm565_vm0 = vcmask (!%p1540_p0), 261120  }
  0x29   : > { %s526_s13 = scalar_lea.vmem %s2373_s0, %s2049_s30  ;;  %s531_s19 = scalar_lea.vmem %s2374_s1, %s1560_s17 }
  0x2a   : > { %s535_s16 = scalar_lea.vmem %s2375_s2, %s2049_s30  ;;  %s1561_s18 = sshll.u32 %s2068_s10, 6  ;;  %v564_v0 = vld [vmem:[%s526_s13] sm:$0xff] (!%p1540_p0)  ;;  %v568_v2 = vld [vmem:[%s531_s19 + $0x8] sm:$0xff] (!%p1540_p0) }
  0x2b   : > { %s546_s17 = scalar_lea.vmem %s2331_s5, %s2068_s10  ;;  %s2082_s0 = scalar_lea.vmem %s2330_s4, %s1561_s18  ;;  %v567_v1 = vld [vmem:[%s531_s19] sm:$0xff] (!%p1540_p0)  ;;  %566 = vst.msk [vmem:[#allocation2] sm:$0xff] (!%p1540_p0), %vm565_vm0, %v564_v0  ;;  %570 = vst.msk [vmem:[#allocation3 + $0x8] sm:$0xff] (!%p1540_p0), %vm565_vm0, %v568_v2 }
  0x2c   : > { %s2087_s12 = scalar_lea.vmem %s2332_s6, %s1561_s18  ;;  %s554_s1 = scalar_lea.vmem %s2333_s7, %s2068_s10  ;;  %569 = vst.msk [vmem:[#allocation3] sm:$0xff] (!%p1540_p0), %vm565_vm0, %v567_v1 }
  0x2d   : > { %s522_s2 = scalar_lea.vmem [#allocation6], %s2041_s20  ;;  %563 = sbr.rel (%p1540_p0) target bundleno = 52 (0x34), region = 64 }
  0x34 PF: > { %v2096_v3 = vld [vmem:[#allocation3] sm:$0xff]  ;;  %v2098_v4 = vld [vmem:[#allocation3 + $0x8] sm:$0xff]  ;;  %vm582_vm1 = vcmask 261120   ;;  %v1899_v5 = vmov 0.0   ;;  %vm1900_vm2 = vmmov 0   ;;  %v576_v7 = vld [vmem:[%s535_s16] sm:$0xff]  ;;  %s2376_s19 = scalar_lea.vmem %s2329_s3, %s2045_s29 }
  0x35   : > { %1591 = vmatprep.subr.bf16.mxu0 %v1899_v5  ;;  %v575_v6 = vpack.c.bf16 %v2098_v4, %v2096_v3  ;;  %1593 = vmatprep.mubr.msk.bf16.mxu0 %vm1900_vm2, %v1899_v5  ;;  %v1901_v8 = vmov 0   ;;  %v2107_v10 = vld [vmem:[#allocation2] sm:$0xff]  ;;  %vm637_vm3 = vcmask 130048   ;;  %vm750_vm4 = vcmask 1043456   ;;  %v888_v62 = vld [vmem:[%s2082_s0 + $0x28] sm:$0xff]  ;;  %v889_v2 = vld [vmem:[%s2082_s0 + $0x30] sm:$0xff] }
  0x36   : > { %1758 = vset.pattern.permute.xlu0 %v1901_v8  ;;  %1597 = vmatprep.subr.bf16.mxu1 %v1899_v5  ;;  %v574_v11 = vpack.c.bf16 %v2107_v10, %v2107_v10  ;;  %v1542_v14 = vld [vmem:[%s2376_s19] ss:$0 sm:$0xff]  ;;  %vm746_vm5 = vcmask 64512   ;;  %p1553_p1 = scmp.ne.s32.totalorder %s1881_s24, 1 }
  0x37   : > { %v587_v9 = vsel %vm582_vm1, %v575_v6, 0  ;;  %579 = vperm.xlu0 %1758, %v576_v7   ;;  %1598 = vmatpush3.bf16.msra.mxu1 %v575_v6  ;;  %v887_v61 = vld [vmem:[%s2082_s0 + $0x20] sm:$0xff]  ;;  %v890_v6 = vld [vmem:[%s2082_s0 + $0x38] sm:$0xff]  ;;  %vm1171_vm6 = vcmask (!%p1553_p1), 7168   ;;  %vm1173_vm7 = vcmask (!%p1553_p1), 122880   ;;  %s2377_s13 = scalar_lea.vmem (!%p1553_p1), %s2337_s11, %s2049_s30  ;;  %vm1903_vm8 = vmmov (!%p1553_p1), 0  }
  0x38   : > { %1592 = vmatpush3.bf16.xpose.msra.mxu0 %v587_v9  ;;  %1599 = vmatprep.mubr.msk.bf16.mxu1 %vm1900_vm2, %v1899_v5  ;;  %v751_v48 = vsel %vm750_vm4, %v574_v11, 0  ;;  %v891_v1 = vpack.c.bf16 %v888_v62, %v887_v61  ;;  %v892_v7 = vpack.c.bf16 %v890_v6, %v889_v2  ;;  %v993_v8 = vld [vmem:[%s2087_s12 + $0x20] sm:$0xff]  ;;  %v994_v9 = vld [vmem:[%s2087_s12 + $0x28] sm:$0xff]  ;;  %vm1294_vm9 = vcmask (!%p1553_p1), 253952  }
  0x39   : > { %1603 = vmatprep.subr.bf16.mxu1 %v1899_v5  ;;  %1609 = vmatprep.subr.bf16.mxu0 %v1899_v5 }
  0x3f   : > { %1594 = vmatmul.mubr.msk.bf16.vlgmr.msra.gmra.mrb[0].mxu0 %vm582_vm1, %v574_v11  ;;  %v997_v11 = vpack.c.bf16 %v994_v9, %v993_v8 }
  0x40   : > { %1611 = vmatprep.mubr.msk.bf16.mxu0 %vm1900_vm2, %v1899_v5 }
  0xb6   : > { %v580_v12 = vpop.permute.xlu0 %579 }
 0x112   : > { %v623_v13 = vpop.f32.mrb[0].mxu0 }
 0x113   : > { %v624_v15 = vadd.f32 %v623_v13, %v580_v12  ;;  %v1595_v16 = vpop.f32.mrb[1].mxu0  ;;  %v995_v12 = vld [vmem:[%s2087_s12 + $0x30] sm:$0xff]  ;;  %v996_v13 = vld [vmem:[%s2087_s12 + $0x38] sm:$0xff] }
 0x114   : > { %v626_v17 = vpop.f32.mrb[2].mxu0  ;;  %v881_v16 = vld [vmem:[%s2082_s0 + $0x8] sm:$0xff] }
 0x115   : > { %v636_v18 = vadd.f32 %v1542_v14, %v624_v15  ;;  %v1596_v19 = vpop.f32.mrb[3].mxu0  ;;  %v998_v14 = vpack.c.bf16 %v996_v13, %v995_v12  ;;  %v880_v15 = vld [vmem:[%s2082_s0] sm:$0xff] }
 0x116   : > { %v885_v17 = vpack.c.bf16 %v881_v16, %v880_v15  ;;  %v883_v19 = vld [vmem:[%s2082_s0 + $0x18] sm:$0xff] }
 0x117   : > { %v638_v20 = vsel %vm637_vm3, %v636_v18, -inf }
 0x118   : > { %639 = vmax.xlane.f32.xlu0 %v638_v20  ;;  %v641_v21 = vrot.slane %v638_v20, 4 }
 0x11a   : > { %v642_v22 = vmax.f32 %v638_v20, %v641_v21 }
 0x11c   : > { %v643_v23 = vrot.slane %v642_v22, 2 }
 0x11e   : > { %v644_v24 = vmax.f32 %v642_v22, %v643_v23 }
 0x120   : > { %v645_v25 = vrot.slane %v644_v24, 1 }
 0x122   : > { %v2126_v27 = vmax.f32 %v644_v24, %v645_v25 }
 0x124   : > { %v650_v30 = vsub.f32 %v636_v18, %v2126_v27  ;;  %1174 = vst.msk [vmem:[%s522_s2] sm:$0x1] (!%p1553_p1), %vm1173_vm7, %v2126_v27  ;;  %v1200_v27 = vld [vmem:[%s2334_s8 + $0x30] sm:$0xff] (!%p1553_p1) }
 0x126   : > { %v651_v31 = vmul.f32 1.442695, %v650_v30 }
 0x1a5   : > { %v2124_v26 = vpop.xlane.xlu0 %639 }
 0x1a6   : > { %v647_v28 = vsub.f32 %v636_v18, %v2124_v26  ;;  %v882_v18 = vld [vmem:[%s2082_s0 + $0x10] sm:$0xff]  ;;  %1172 = vst.msk [vmem:[%s2377_s13] sm:$0xff] (!%p1553_p1), %vm1171_vm6, %v2124_v26 }
 0x1a7   : > { %v886_v20 = vpack.c.bf16 %v883_v19, %v882_v18 }
 0x1a8   : > { %v648_v29 = vmul.f32 1.442695, %v647_v28  ;;  %v986_v28 = vld [vmem:[%s2087_s12] sm:$0xff] }
 0x1aa   : > { %1759 = vpow2.f32 %v648_v29  ;;  %v987_v29 = vld [vmem:[%s2087_s12 + $0x8] sm:$0xff] }
 0x1ab   : > { %1761 = vpow2.f32 %v651_v31  ;;  %v991_v31 = vpack.c.bf16 %v987_v29, %v986_v28 }
 0x1b4   : > { %v1760_v32 = vpop.eup %1759 }
 0x1b5   : > { %v653_v33 = vsel %vm637_vm3, %v1760_v32, 0.0  ;;  %v1762_v34 = vpop.eup %1761 }
 0x1b6   : > { %654 = vadd.xlane.f32.xlu1 %v653_v33  ;;  %v659_v35 = vsel %vm637_vm3, %v1762_v34, 0.0 }
 0x1b7   : > { %v660_v36 = vrot.slane %v659_v35, 4 }
 0x1b9   : > { %v661_v37 = vadd.f32 %v660_v36, %v659_v35  ;;  %v989_v35 = vld [vmem:[%s2087_s12 + $0x18] sm:$0xff] }
 0x1bb   : > { %v662_v38 = vrot.slane %v661_v37, 2 }
 0x1bd   : > { %v663_v39 = vadd.f32 %v662_v38, %v661_v37 }
 0x1bf   : > { %v664_v40 = vrot.slane %v663_v39, 1 }
 0x1c1   : > { %v665_v41 = vadd.f32 %v664_v40, %v663_v39 }
 0x1c3   : > { %1763 = vrcp.f32 %v665_v41 }
 0x1cd   : > { %v1764_v42 = vpop.eup %1763 }
 0x1ce   : > { %v668_v43 = vmul.f32 %v1764_v42, %v1762_v34  ;;  %v988_v34 = vld [vmem:[%s2087_s12 + $0x10] sm:$0xff] }
 0x1cf   : > { %v992_v38 = vpack.c.bf16 %v989_v35, %v988_v34 }
 0x1e9   : > { %669 = vxpose.xlu1.b32.start.end [1/1] (short) (narrow) %v668_v43, 16 }
 0x243   : > { %v655_v44 = vpop.xlane.xlu1 %654 }
 0x244   : > { %1765 = vrcp.f32 %v655_v44 }
 0x24e   : > { %v1766_v45 = vpop.eup %1765 }
 0x24f   : > { %v658_v46 = vmul.f32 %v1766_v45, %v1760_v32 }
 0x251   : > { %v701_v47 = vpack.c.bf16 %v658_v46, %v658_v46 }
 0x253   : > { %1600 = vmatmul.mubr.msk.bf16.vlgmr.msra.gmra.mrb[0].mxu1 %vm637_vm3, %v701_v47 }
 0x254   : > { %1604 = vmatpush3.bf16.msra.mxu1 %v751_v48  ;;  %1605 = vmatprep.mubr.msk.bf16.mxu1 %vm1900_vm2, %v1899_v5  ;;  %v1549_v48 = vld [vmem:[%s546_s17] ss:$0 sm:$0xff] }
 0x255   : > { %1615 = vmatprep.subr.bf16.mxu1 %v1899_v5 }
 0x269   : > { %v685_v49 = vpop.trf.xlu1 }
 0x26d   : > { %v686_v50 = vpop.trf.xlu1 }
 0x26e   : > { %v745_v51 = vpack.c.bf16 %v686_v50, %v685_v49 }
 0x270   : > { %1606 = vmatmul.mubr.msk.bf16.vlgmr.msra.gmra.mrb[4].mxu1 %vm746_vm5, %v745_v51 }
 0x271   : > { %1617 = vmatprep.mubr.msk.bf16.mxu1 %vm1900_vm2, %v1899_v5 }
 0x326   : > { %v739_v52 = vpop.f32.mrb[0].mxu1 }
 0x327   : > { %v835_v53 = vpack.c.bf16 %v739_v52, %v739_v52  ;;  %v1601_v54 = vpop.f32.mrb[1].mxu1 }
 0x328   : > { %v742_v55 = vpop.f32.mrb[2].mxu1 }
 0x329   : > { %v837_v56 = vsel %vm750_vm4, %v835_v53, 0  ;;  %v1602_v57 = vpop.f32.mrb[3].mxu1 }
 0x32a   : > { %1616 = vmatpush3.bf16.msra.mxu1 %v837_v56 }
 0x32b   : > { %1629 = vmatprep.subr.bf16.mxu1 %v1899_v5 }
 0x32d   : > { %1618 = vmatmul.mubr.msk.bf16.vlgmr.msra.gmra.mrb[8].mxu1 %vm746_vm5, %v745_v51 }
 0x32e   : > { %1633 = vmatprep.mubr.msk.bf16.mxu1 %vm1900_vm2, %v1899_v5  ;;  %1630 = vmatpush3.bf16.msra.mxu1 %v885_v17 }
 0x32f   : > { %1631 = vmatprep.subr.bf16.mxu1 %v1899_v5 }
 0x332   : > { %1632 = vmatpush3.bf16.msra.mxu1 %v886_v20 }
 0x333   : > { %1645 = vmatprep.subr.bf16.mxu1 %v1899_v5 }
 0x343   : > { %v787_v58 = vpop.f32.mrb[4].mxu1 }
 0x344   : > { %v1607_v59 = vpop.f32.mrb[5].mxu1 }
 0x345   : > { %v790_v60 = vpop.f32.mrb[6].mxu1 }
 0x346   : > { %v794_v63 = vpack.c.bf16 %v790_v60, %v787_v58  ;;  %v1608_v0 = vpop.f32.mrb[7].mxu1 }
 0x348   : > { %1610 = vmatpush3.bf16.msra.mxu0 %v794_v63 }
 0x349   : > { %1621 = vmatprep.subr.bf16.mxu0 %v1899_v5 }
 0x34b   : > { %1612 = vmatmul.mubr.msk.bf16.vlgmr.msra.gmra.mrb[4].mxu0 %vm637_vm3, %v701_v47 }
 0x34c   : > { %1622 = vmatpush3.bf16.msra.mxu0 %v891_v1  ;;  %1625 = vmatprep.mubr.msk.bf16.mxu0 %vm1900_vm2, %v1899_v5 }
 0x34d   : > { %1623 = vmatprep.subr.bf16.mxu0 %v1899_v5 }
 0x350   : > { %1624 = vmatpush3.bf16.msra.mxu0 %v892_v7 }
 0x351   : > { %1637 = vmatprep.subr.bf16.mxu0 %v1899_v5 }
 0x353   : > { %1626 = vmatmul.mubr.msk.bf16.vlgmr.msra.gmra.mrb[8].mxu0 %vm582_vm1, %v835_v53 }
 0x354   : > { %1638 = vmatpush3.bf16.msra.mxu0 %v997_v11  ;;  %1641 = vmatprep.mubr.msk.bf16.mxu0 %vm1900_vm2, %v1899_v5 }
 0x355   : > { %1639 = vmatprep.subr.bf16.mxu0 %v1899_v5 }
 0x358   : > { %1640 = vmatpush3.bf16.msra.mxu0 %v998_v14 }
 0x35b   : > { %1642 = vmatmul.mubr.msk.bf16.vlgmr.msra.gmra.mrb[12].mxu0 %vm582_vm1, %v794_v63 }
 0x400   : > { %v873_v21 = vpop.f32.mrb[8].mxu1 }
 0x401   : > { %v1619_v22 = vpop.f32.mrb[9].mxu1 }
 0x402   : > { %v876_v23 = vpop.f32.mrb[10].mxu1 }
 0x403   : > { %v990_v24 = vpack.c.bf16 %v876_v23, %v873_v21  ;;  %v1620_v25 = vpop.f32.mrb[11].mxu1 }
 0x41e   : > { %v829_v30 = vpop.f32.mrb[4].mxu0 }
 0x41f   : > { %v884_v32 = vpack.c.bf16 %v829_v30, %v829_v30  ;;  %v1613_v33 = vpop.f32.mrb[5].mxu0 }
 0x420   : > { %v832_v36 = vpop.f32.mrb[6].mxu0 }
 0x421   : > { %v1614_v37 = vpop.f32.mrb[7].mxu0  ;;  %1634 = vmatmul.mubr.msk.bf16.vlgmr.msra.gmra.mrb[12].mxu1 %vm582_vm1, %v884_v32 }
 0x422   : > { %1646 = vmatpush3.bf16.msra.mxu1 %v991_v31  ;;  %1649 = vmatprep.mubr.msk.bf16.mxu1 %vm1900_vm2, %v1899_v5 }
 0x423   : > { %1647 = vmatprep.subr.bf16.mxu1 %v1899_v5 }
 0x426   : > { %v929_v39 = vpop.f32.mrb[8].mxu0  ;;  %1648 = vmatpush3.bf16.msra.mxu1 %v992_v38 }
 0x427   : > { %v1627_v40 = vpop.f32.mrb[9].mxu0 }
 0x428   : > { %v932_v41 = vpop.f32.mrb[10].mxu0 }
 0x429   : > { %v1628_v42 = vpop.f32.mrb[11].mxu0  ;;  %1650 = vmatmul.mubr.msk.bf16.vlgmr.msra.gmra.mrb[16].mxu1 %vm582_vm1, %v990_v24 }
 0x42e   : > { %v1036_v43 = vpop.f32.mrb[12].mxu0 }
 0x42f   : > { %v1643_v44 = vpop.f32.mrb[13].mxu0 }
 0x430   : > { %v1039_v45 = vpop.f32.mrb[14].mxu0 }
 0x431   : > { %v1644_v46 = vpop.f32.mrb[15].mxu0 }
 0x4f4   : > { %v972_v47 = vpop.f32.mrb[12].mxu1 }
 0x4f5   : > { %v973_v49 = vadd.f32 %v972_v47, %v929_v39  ;;  %v1635_v50 = vpop.f32.mrb[13].mxu1 }
 0x4f6   : > { %v975_v5 = vpop.f32.mrb[14].mxu1 }
 0x4f7   : > { %v985_v51 = vadd.f32 %v1549_v48, %v973_v49  ;;  %v1636_v52 = vpop.f32.mrb[15].mxu1 }
 0x4f9   : > { %v1096_v53 = vadd.f32 %v985_v51, %v2107_v10  ;;  %v1552_v10 = vld [vmem:[%s554_s1] ss:$0 sm:$0xff] }
 0x4fb   : > { %v1097_v54 = vsel %vm582_vm1, %v1096_v53, 0.0 }
 0x4fc   : > { %v1080_v55 = vpop.f32.mrb[16].mxu1  ;;  %1098 = vadd.xlane.f32.xlu0 %v1097_v54 }
 0x4fd   : > { %v1081_v56 = vadd.f32 %v1080_v55, %v1036_v43  ;;  %v1651_v57 = vpop.f32.mrb[17].mxu1 }
 0x4fe   : > { %v1083_v58 = vpop.f32.mrb[18].mxu1 }
 0x4ff   : > { %v1084_v59 = vadd.f32 %v1083_v58, %v1039_v45  ;;  %v1652_v60 = vpop.f32.mrb[19].mxu1  ;;  %v1094_v9 = vadd.f32 %v1552_v10, %v1081_v56 }
 0x500   : > { %v1191_v60 = vld [vmem:[%s2334_s8] sm:$0xff] (!%p1553_p1) }
 0x501   : > { %v1095_v7 = vadd.f32 %v1552_v10, %v1084_v59  ;;  %v1126_v15 = vadd.f32 %v1094_v9, %v2096_v3 }
 0x503   : > { %v1127_v13 = vadd.f32 %v1095_v7, %v2098_v4  ;;  %v1128_v18 = vsel %vm582_vm1, %v1126_v15, 0.0 }
 0x505   : > { %v1129_v17 = vsel %vm582_vm1, %v1127_v13, 0.0 }
 0x506   : > { %v1130_v19 = vadd.f32 %v1129_v17, %v1128_v18 }
 0x589   : > { %v1099_v61 = vpop.xlane.xlu0 %1098 }
 0x58a   : > { %v1100_v62 = vrot.slane %v1099_v61, 4 }
 0x58c   : > { %v1101_v63 = vadd.f32 %v1100_v62, %v1099_v61  ;;  %v1192_v61 = vld [vmem:[%s2334_s8 + $0x8] sm:$0xff] (!%p1553_p1)  ;;  %v1198_v62 = vld [vmem:[%s2334_s8 + $0x20] sm:$0xff] (!%p1553_p1) }
 0x58e   : > { %v1102_v0 = vrot.slane %v1101_v63, 2 }
 0x590   : > { %v1103_v1 = vadd.f32 %v1102_v0, %v1101_v63  ;;  %v1902_v63 = vmov (!%p1553_p1), 0.0   ;;  %v1196_v0 = vpack.c.bf16 (!%p1553_p1), %v1192_v61, %v1191_v60 }
 0x591   : > { %1661 = vmatprep.subr.bf16.mxu1 (!%p1553_p1), %v1902_v63  ;;  %1653 = vmatprep.subr.bf16.mxu0 (!%p1553_p1), %v1902_v63 }
 0x592   : > { %v1104_v2 = vrot.slane %v1103_v1, 1  ;;  %1665 = vmatprep.mubr.msk.bf16.mxu1 (!%p1553_p1), %vm1903_vm8, %v1902_v63  ;;  %1657 = vmatprep.mubr.msk.bf16.mxu0 (!%p1553_p1), %vm1903_vm8, %v1902_v63 }
 0x593   : > { %1662 = vmatpush3.bf16.msra.mxu1 (!%p1553_p1), %v1196_v0 }
 0x594   : > { %v1105_v6 = vadd.f32 %v1104_v2, %v1103_v1  ;;  %v1199_v1 = vld [vmem:[%s2334_s8 + $0x28] sm:$0xff] (!%p1553_p1)  ;;  %v1193_v2 = vld [vmem:[%s2334_s8 + $0x10] sm:$0xff] (!%p1553_p1)  ;;  %1663 = vmatprep.subr.bf16.mxu1 (!%p1553_p1), %v1902_v63 }
 0x595   : > { %v1203_v7 = vpack.c.bf16 (!%p1553_p1), %v1199_v1, %v1198_v62 }
 0x596   : > { %1669 = vpush %v1105_v6  ;;  %v1194_v6 = vld [vmem:[%s2334_s8 + $0x18] sm:$0xff] (!%p1553_p1) }
 0x597   : > { %1654 = vmatpush3.bf16.msra.mxu0 (!%p1553_p1), %v1203_v7 }
 0x598   : > { %1655 = vmatprep.subr.bf16.mxu0 (!%p1553_p1), %v1902_v63 }
 0x5c7   : > { %s1670_s26 = spop %1669 }
 0x5c8   : > { %v1107_v8 = vstv %s1670_s26 }
 0x5c9   : > { %v1108_v11 = vmul.f32 0.00390625, %v1107_v8  ;;  %v1201_v8 = vld [vmem:[%s2334_s8 + $0x38] sm:$0xff] (!%p1553_p1) }
 0x5cb   : > { %v1109_v12 = vsub.f32 %v1096_v53, %v1108_v11 }
 0x5cd   : > { %v1110_v14 = vmul.f32 %v1109_v12, %v1109_v12 }
 0x5cf   : > { %v1111_v16 = vsel %vm582_vm1, %v1110_v14, 0.0  ;;  %v1204_v14 = vpack.c.bf16 (!%p1553_p1), %v1201_v8, %v1200_v27 }
 0x5d0   : > { %1112 = vadd.xlane.f32.xlu0 %v1111_v16 }
 0x5d1   : > { %1656 = vmatpush3.bf16.msra.mxu0 (!%p1553_p1), %v1204_v14 }
 0x5d4   : > { %1131 = vadd.xlane.f32.xlu0 %v1130_v19 }
 0x65d   : > { %v1113_v20 = vpop.xlane.xlu0 %1112 }
 0x65e   : > { %v1114_v21 = vrot.slane %v1113_v20, 4 }
 0x660   : > { %v1115_v22 = vadd.f32 %v1114_v21, %v1113_v20 }
 0x661   : > { %v1132_v23 = vpop.xlane.xlu0 %1131 }
 0x662   : > { %v1116_v24 = vrot.slane %v1115_v22, 2  ;;  %v1133_v25 = vrot.slane %v1132_v23, 4 }
 0x664   : > { %v1134_v28 = vadd.f32 %v1133_v25, %v1132_v23  ;;  %v1117_v4 = vadd.f32 %v1116_v24, %v1115_v22 }
 0x666   : > { %v1135_v29 = vrot.slane %v1134_v28, 2  ;;  %v1118_v30 = vrot.slane %v1117_v4, 1 }
 0x668   : > { %v1119_v3 = vadd.f32 %v1118_v30, %v1117_v4  ;;  %v1136_v31 = vadd.f32 %v1135_v29, %v1134_v28 }
 0x66a   : > { %1671 = vpush %v1119_v3  ;;  %v1137_v32 = vrot.slane %v1136_v31, 1 }
 0x66c   : > { %v1138_v33 = vadd.f32 %v1137_v32, %v1136_v31  ;;  %v1291_v32 = vld [vmem:[%s2335_s9] sm:$0x1] (!%p1553_p1) }
 0x66e   : > { %1673 = vpush %v1138_v33 }
 0x69b   : > { %s1672_s1 = spop %1671 }
 0x69c   : > { %v1121_v34 = vstv %s1672_s1 }
 0x69d   : > { %v1122_v35 = vmul.f32 0.00390625, %v1121_v34 }
 0x69f   : > { %v1123_v36 = vadd.f32 1e-05, %v1122_v35  ;;  %s1674_s10 = spop %1673 }
 0x6a0   : > { %v1140_v37 = vstv %s1674_s10 }
 0x6a1   : > { %1767 = vrsqrt.f32 %v1123_v36  ;;  %v1141_v38 = vmul.f32 0.001953125, %v1140_v37 }
 0x6a3   : > { %v1142_v39 = vsub.f32 %v1126_v15, %v1141_v38  ;;  %v1143_v40 = vsub.f32 %v1127_v13, %v1141_v38 }
 0x6a5   : > { %v1144_v41 = vmul.f32 %v1142_v39, %v1142_v39  ;;  %v1145_v42 = vmul.f32 %v1143_v40, %v1143_v40 }
 0x6a7   : > { %v1146_v43 = vsel %vm582_vm1, %v1144_v41, 0.0  ;;  %v1147_v44 = vsel %vm582_vm1, %v1145_v42, 0.0 }
 0x6a8   : > { %v1148_v45 = vadd.f32 %v1147_v44, %v1146_v43 }
 0x6aa   : > { %1149 = vadd.xlane.f32.xlu0 %v1148_v45 }
 0x6ab   : > { %v1768_v46 = vpop.eup %1767 }
 0x6ac   : > { %v1125_v47 = vmul.f32 %v1768_v46, %v1109_v12  ;;  %v1197_v12 = vpack.c.bf16 (!%p1553_p1), %v1194_v6, %v1193_v2 }
 0x6ae   : > { %1164 = vst.msk [vmem:[#allocation2] sm:$0xff] %vm582_vm1, %v1125_v47  ;;  %v1175_v10 = vsel (!%p1553_p1), %vm582_vm1, %v1125_v47, -inf  ;;  %1664 = vmatpush3.bf16.msra.mxu1 (!%p1553_p1), %v1197_v12 }
 0x6af   : > { %v1176_v9 = vrot.slane (!%p1553_p1), %v1175_v10, 4 }
 0x6b1   : > { %v1177_v15 = vmax.f32 (!%p1553_p1), %v1175_v10, %v1176_v9 }
 0x6b3   : > { %v1178_v17 = vrot.slane (!%p1553_p1), %v1177_v15, 2 }
 0x6b5   : > { %v1179_v19 = vmax.f32 (!%p1553_p1), %v1177_v15, %v1178_v17 }
 0x6b7   : > { %v1180_v21 = vrot.slane (!%p1553_p1), %v1179_v19, 1 }
 0x6b9   : > { %v1181_v23 = vmax.f32 (!%p1553_p1), %v1179_v19, %v1180_v21 }
 0x6bb   : > { %v1195_v25 = vpack.c.bf16 (!%p1553_p1), %v1181_v23, %v1181_v23 }
 0x6bd   : > { %1666 = vmatmul.mubr.msk.bf16.vlgmr.msra.gmra.mrb[0].mxu1 (!%p1553_p1), %vm582_vm1, %v1195_v25 }
 0x737   : > { %v1150_v48 = vpop.xlane.xlu0 %1149 }
 0x738   : > { %v1151_v49 = vrot.slane %v1150_v48, 4 }
 0x73a   : > { %v1152_v50 = vadd.f32 %v1151_v49, %v1150_v48 }
 0x73c   : > { %v1153_v5 = vrot.slane %v1152_v50, 2 }
 0x73e   : > { %v1154_v51 = vadd.f32 %v1153_v5, %v1152_v50 }
 0x740   : > { %v1155_v52 = vrot.slane %v1154_v51, 1 }
 0x742   : > { %v1156_v53 = vadd.f32 %v1155_v52, %v1154_v51 }
 0x744   : > { %1675 = vpush %v1156_v53 }
 0x775   : > { %s1676_s27 = spop %1675 }
 0x776   : > { %v1158_v54 = vstv %s1676_s27 }
 0x777   : > { %v1159_v55 = vmul.f32 0.001953125, %v1158_v54 }
 0x779   : > { %v1160_v56 = vadd.f32 1e-05, %v1159_v55 }
 0x77b   : > { %1769 = vrsqrt.f32 %v1160_v56 }
 0x782   : > { %1170 = sbr.rel (%p1553_p1) target bundleno = 2164 (0x874), region = 68 }
 0x785   : > { %v1770_v57 = vpop.eup %1769 }
 0x786   : > { %v1162_v58 = vmul.f32 %v1770_v57, %v1142_v39  ;;  %v1163_v59 = vmul.f32 %v1770_v57, %v1143_v40 }
 0x788   : > { %1165 = vst.msk [vmem:[#allocation3] sm:$0xff] %vm582_vm1, %v1162_v58  ;;  %1166 = vst.msk [vmem:[#allocation3 + $0x8] sm:$0xff] %vm582_vm1, %v1163_v59  ;;  %v1182_v26 = vsel (!%p1553_p1), %vm582_vm1, %v1162_v58, -inf  ;;  %v1183_v11 = vsel (!%p1553_p1), %vm582_vm1, %v1163_v59, -inf }
 0x789   : > { %v1184_v13 = vmax.f32 %v1182_v26, %v1183_v11 }
 0x78b   : > { %v1185_v16 = vrot.slane %v1184_v13, 4 }
 0x78d   : > { %v1186_v18 = vmax.f32 %v1184_v13, %v1185_v16 }
 0x78f   : > { %v1187_v20 = vrot.slane %v1186_v18, 2 }
 0x790   : > { %v1285_v29 = vpop.f32.mrb[0].mxu1 }
 0x791   : > { %v1188_v22 = vmax.f32 %v1186_v18, %v1187_v20  ;;  %v1667_v30 = vpop.f32.mrb[1].mxu1 }
 0x792   : > { %v1288_v3 = vpop.f32.mrb[2].mxu1 }
 0x793   : > { %v1189_v24 = vrot.slane %v1188_v22, 1  ;;  %v1668_v33 = vpop.f32.mrb[3].mxu1 }
 0x795   : > { %v1190_v28 = vmax.f32 %v1188_v22, %v1189_v24 }
 0x797   : > { %v1202_v4 = vpack.c.bf16 %v1190_v28, %v1190_v28 }
 0x799   : > { %1658 = vmatmul.mubr.msk.bf16.vlgmr.msra.gmra.mrb[0].mxu0 %vm582_vm1, %v1202_v4 }
 0x86c   : > { %v1242_v31 = vpop.f32.mrb[0].mxu0 }
 0x86d   : > { %v1286_v34 = vadd.f32 %v1285_v29, %v1242_v31  ;;  %v1659_v35 = vpop.f32.mrb[1].mxu0 }
 0x86e   : > { %v1245_v36 = vpop.f32.mrb[2].mxu0 }
 0x86f   : > { %v1292_v37 = vadd.f32 %v1291_v32, %v1286_v34  ;;  %v1660_v38 = vpop.f32.mrb[3].mxu0 }
 0x871   : > { %v1293_v39 = vmax.f32 %v1292_v37, 0.0 }
 0x873   : > { %1295 = vst.msk [vmem:[%s510_s14] sm:$0x1] %vm1294_vm9, %v1293_v39 }
 0x874 PF: > { %s2378_s22 = sld [smem:[#allocation13_spill]]  ;;  %s2380_s24 = sld [smem:[#allocation25_spill]] }
 0x875   : > { %s1317_s16 = sshll.u32 %s510_s14, 4  ;;  %s1297_s19 = scalar_lea.sflag [#allocation5], %s2041_s20  ;;  %s1318_s16 = int_to_ptr.vmem [resolvable:$true] %s1317_s16 }
 0x876   : > { %s1771_s0 = scalar_lea.vmem %s1318_s16, 16  ;;  %s1904_s12 = smov [#allocation4]  }
 0x877   : > { %p1772_p2 = scmp.ne.s32.totalorder %s1318_s16, %s1771_s0  ;;  %s1775_s29 = sshll.u32 %s1904_s12, 4  ;;  %s1776_s29 = int_to_ptr.vmem [resolvable:$false] %s1775_s29 }
 0x878   : > { %s1777_s18 = scalar_lea.vmem %s1776_s29, 32  ;;  %p1778_p6 = scmp.lt.s32.totalorder %s1318_s16, %s1776_s29 }
 0x879   : > { %p1773_p4 = pnand %p1772_p2, %p2020_p3  ;;  %p1779_p7 = scmp.lt.s32.totalorder %s1777_s18, %s1771_s0 }
 0x87a   : > { %s1556_s21 = sshll.u32 %s2378_s22, 4  ;;  %s2381_s15 = smov %s2380_s24 }
 0x87b   : > { %s2249_s13 = scalar_lea.hbm %s2380_s24, %s1556_s21  ;;  %p1774_p5 = pneg %p1773_p4 }
 0x87c   : > { %p1780_p8 = por %p1779_p7, %p1778_p6 }
 0x87e   : > { %p1781_p10 = pnand %p1780_p8, %p1774_p5 }
 0x880   : > { %1784 = shalt.err (!%p1781_p10)
}
 0x881   : > { %s1785_s14 = scalar_lea.hbm %s2249_s13, 16  ;;  %s1789_s1 = scalar_lea.hbm %s2381_s15, 32 }
 0x882   : > { %p1786_p11 = scmp.ne.s32.totalorder %s2249_s13, %s1785_s14  ;;  %p1790_p0 = scmp.lt.u32.totalorder %s2249_s13, %s2381_s15 }
 0x883   : > { %p1791_p1 = scmp.lt.u32.totalorder %s1789_s1, %s1785_s14  ;;  %p1793_p4 = scmp.lt.u32.totalorder %s1785_s14, %s2249_s13 }
 0x884   : > { %p1787_p12 = pnand %p1786_p11, %p2020_p3 }
 0x885   : > { %p1792_p2 = por %p1791_p1, %p1790_p0 }
 0x886   : > { %p1788_p13 = pneg %p1787_p12 }
 0x887   : > { %p1794_p5 = por %p1793_p4, %p1792_p2 }
 0x889   : > { %p1795_p6 = pnand %p1794_p5, %p1788_p13 }
 0x88b   : > { %1798 = shalt.err (!%p1795_p6)
}
 0x88c   : > { %1677 = dma.vmem_to_hbm [thread:$0]  (%p2020_p3), %s1318_s16, 16, %s2249_s13, %s1297_s19  }
 0x88d   : > { %s2382_s25 = sld [smem:[#allocation26_spill]]  ;;  %s1333_s12 = sshll.u32 %s522_s2, 4  ;;  %s1334_s12 = int_to_ptr.vmem [resolvable:$true] %s1333_s12 }
 0x88e   : > { %s1305_s29 = scalar_lea.sflag [#allocation7], %s2041_s20  ;;  %s1799_s18 = scalar_lea.vmem %s1334_s12, 16 }
 0x88f   : > { %p1800_p7 = scmp.ne.s32.totalorder %s1334_s12, %s1799_s18  ;;  %s1905_s14 = smov [#allocation6]  }
 0x890   : > { %s1803_s30 = sshll.u32 %s1905_s14, 4  ;;  %s1804_s30 = int_to_ptr.vmem [resolvable:$false] %s1803_s30 }
 0x891   : > { %p1801_p8 = pnand %p1800_p7, %p2020_p3  ;;  %s1805_s26 = scalar_lea.vmem %s1804_s30, 32 }
 0x892   : > { %p1806_p11 = scmp.lt.s32.totalorder %s1334_s12, %s1804_s30  ;;  %p1807_p12 = scmp.lt.s32.totalorder %s1805_s26, %s1799_s18 }
 0x893   : > { %s2383_s0 = smov %s2382_s25  ;;  %s2276_s24 = scalar_lea.hbm %s2382_s25, %s1556_s21 }
 0x894   : > { %p1802_p10 = pneg %p1801_p8  ;;  %p1808_p13 = por %p1807_p12, %p1806_p11 }
 0x896   : > { %p1809_p0 = pnand %p1808_p13, %p1802_p10 }
 0x898   : > { %1812 = shalt.err (!%p1809_p0)
}
 0x899   : > { %s1813_s2 = scalar_lea.hbm %s2276_s24, 16  ;;  %s1817_s21 = scalar_lea.hbm %s2383_s0, 32 }
 0x89a   : > { %p1814_p1 = scmp.ne.s32.totalorder %s2276_s24, %s1813_s2  ;;  %p1818_p5 = scmp.lt.u32.totalorder %s2276_s24, %s2383_s0 }
 0x89b   : > { %p1819_p6 = scmp.lt.u32.totalorder %s1817_s21, %s1813_s2  ;;  %p1821_p8 = scmp.lt.u32.totalorder %s1813_s2, %s2276_s24 }
 0x89c   : > { %p1815_p2 = pnand %p1814_p1, %p2020_p3 }
 0x89d   : > { %p1820_p7 = por %p1819_p6, %p1818_p5 }
 0x89e   : > { %p1816_p4 = pneg %p1815_p2 }
 0x89f   : > { %p1822_p10 = por %p1821_p8, %p1820_p7 }
 0x8a1   : > { %p1823_p11 = pnand %p1822_p10, %p1816_p4 }
 0x8a3   : > { %1826 = shalt.err (!%p1823_p11)
}
 0x8a4   : > { %1678 = dma.vmem_to_hbm [thread:$0]  (%p2020_p3), %s1334_s12, 16, %s2276_s24, %s1305_s29  }
 0x8a5 PF: > { %s2384_s19 = sld [smem:[#allocation16_spill]]  ;;  %s2385_s1 = sld [smem:[#allocation10_spill]] }
 0x8ab   : > { %p1688_p12 = scmp.ge.s32.totalorder %s2384_s19, 2  ;;  %s1345_s27 = sand.u32 1, %s2385_s1  }
 0x8ac   : > { %s1346_s17 = scalar_lea.sflag [#allocation5], %s1345_s27 }
 0x8ad   : > { %p1682_p13 = pnand %p1688_p12, %p2030_p9 }
 0x8af   : > { %1860 = dma.done.wait (!%p1682_p13), %s1346_s17, 16  }
 0x8b0   : > { %1862 = vsyncadd (!%p1682_p13), %s1346_s17, 4294967280  ;;  %s1361_s28 = scalar_lea.sflag [#allocation7], %s1345_s27 }
 0x8b1   : > { %1864 = dma.done.wait (!%p1682_p13), %s1361_s28, 16  }
 0x8b2   : > { %1866 = vsyncadd (!%p1682_p13), %s1361_s28, 4294967280  ;;  %s29_s28 = sadd.s32 1, %s2384_s19   ;;  %s2387_s21 = sld [smem:[#allocation11_spill]] }
 0x8b3   : > { %p26_p0 = scmp.ge.s32.totalorder %s29_s28, 6   ;;  %s2388_s22 = sld [smem:[#allocation12_spill]] }
 0x8b4   : > { %s2389_s23 = sld [smem:[#allocation21_spill]]  ;;  %s2390_s24 = sld [smem:[#allocation14_spill]] }
 0x8b5   : > { %s2391_s25 = sld [smem:[#allocation15_spill]]  ;;  %s2392_s26 = sld [smem:[#allocation17_spill]] }
 0x8b6   : > { %s2393_s27 = sld [smem:[#allocation19_spill]]  ;;  %28 = sbr.rel (!%p26_p0) target bundleno = 13 (0xd), region = 153 }
 0x8bd   :  { %1365 = vsyncpa [#allocation5], 1 }
 0x8be   :  { %1367 = vsyncpa [#allocation5 + $0x1], 1 }
 0x8bf   :  { %1368 = vsyncpa [#allocation7], 1 }
 0x8c0   :  { %1370 = vsyncpa [#allocation7 + $0x1], 1 }

</bundles_post_ra>
